<compile_context>
chip_gen: v7x
topology: tpu7x:2x2x1
jax: 0.10.0
libtpu: 0.0.40
codegen_flags: <defaults>
</compile_context>

<pallas_src>
import jax
import jax.numpy as jnp
from jax.experimental import pallas as pl
from jax.experimental.pallas import tpu as pltpu

H1, H2, H3 = 128, 256, 128   # hidden sizes from the module definition
LANE = 128


def _round_up(x, m):
    return (x + m - 1) // m * m


def _pick_tb(batch, tb_max):
    """Pick a batch tile: multiple of 8, <= tb_max, minimizing row padding."""
    b8 = _round_up(batch, 8)
    tb_max = max(8, tb_max - tb_max % 8)
    if b8 <= tb_max:
        return b8                      # single tile, no padding
    best_tb, best_pad = None, None
    for tb in range(tb_max, 7, -8):    # largest tile first
        pad = _round_up(b8, tb) - b8
        if pad == 0:
            return tb                  # largest divisor-friendly tile
        if best_pad is None or pad < best_pad:
            best_tb, best_pad = tb, pad
    return best_tb


def nn_expert_kernel(x_ref, w1_ref, b1_ref, w2_ref, b2_ref,
                     w3_ref, b3_ref, w4_ref, b4_ref, o_ref):
    # Layer 1: Linear(input_size, 128) + ReLU
    # x cast to bf16 in-kernel (MXU operands bf16, f32 accumulation).
    x = x_ref[...].astype(jnp.bfloat16)
    h = jnp.dot(x, w1_ref[...], preferred_element_type=jnp.float32) + b1_ref[...]
    h = jnp.maximum(h, 0.0)

    # Dropout(p): identity in eval/inference mode.
    # TODO(synk): training-mode dropout (pltpu.prng_random_bits mask + 1/(1-p) scale).

    # Layer 2: Linear(128, 256) + ReLU
    h = jnp.dot(h.astype(jnp.bfloat16), w2_ref[...],
                preferred_element_type=jnp.float32) + b2_ref[...]
    h = jnp.maximum(h, 0.0)

    # Layer 3: Linear(256, 128) + ReLU
    h = jnp.dot(h.astype(jnp.bfloat16), w3_ref[...],
                preferred_element_type=jnp.float32) + b3_ref[...]
    h = jnp.maximum(h, 0.0)

    # Layer 4: Linear(128, output_size) + Tanh (output lane-padded to 128)
    h = jnp.dot(h.astype(jnp.bfloat16), w4_ref[...],
                preferred_element_type=jnp.float32) + b4_ref[...]
    o_ref[...] = jnp.tanh(h).astype(o_ref.dtype)


def nn_expert_forward(x, params, out_size, *, tb=512):
    """Forward pass of NNExpert. x may be 2D (B, F) or 3D (B, S, D)."""
    if x.ndim == 3:  # mirror: x = x.view(x.size(0), -1)
        x = x.reshape(x.shape[0], -1)
    w1, b1, w2, b2, w3, b3, w4, b4 = params

    B, F_in = x.shape
    N_pad = w4.shape[1]   # output features padded to a multiple of 128 at init

    TB = _pick_tb(B, tb)
    B_pad = _round_up(B, TB)

    # Only row-pad when B doesn't divide into TB tiles (no K padding of x).
    x_in = x if B_pad == B else jnp.zeros((B_pad, F_in), x.dtype).at[:B].set(x)

    grid = (B_pad // TB,)

    x_spec = pl.BlockSpec((TB, F_in), lambda i: (i, 0))
    out_spec = pl.BlockSpec((TB, N_pad), lambda i: (i, 0))
    # Constant index maps: weights/biases are revisited every step and stay
    # VMEM-resident (no per-step DMA).
    const = lambda shape: pl.BlockSpec(shape, lambda i: (0, 0))

    flops = 2 * B_pad * (F_in * H1 + H1 * H2 + H2 * H3 + H3 * N_pad)
    bytes_accessed = (int(x_in.size) * x_in.dtype.itemsize
                      + B_pad * N_pad * 2
                      + sum(int(p.size) * p.dtype.itemsize for p in params))
    cost = pl.CostEstimate(flops=flops,
                           transcendentals=B_pad * N_pad,
                           bytes_accessed=bytes_accessed)

    out_padded = pl.pallas_call(
        nn_expert_kernel,
        out_shape=jax.ShapeDtypeStruct((B_pad, N_pad), jnp.bfloat16),
        grid=grid,
        in_specs=[
            x_spec,
            const(w1.shape), const(b1.shape),
            const(w2.shape), const(b2.shape),
            const(w3.shape), const(b3.shape),
            const(w4.shape), const(b4.shape),
        ],
        out_specs=out_spec,
        # "parallel" shards the batch grid across cores on megacore/2-TC parts
        # (v7x); for a forced split one could use pltpu.CORE_PARALLEL instead.
        compiler_params=pltpu.CompilerParams(
            dimension_semantics=("parallel",)),
        cost_estimate=cost,
    )(x_in, w1, b1, w2, b2, w3, b3, w4, b4)

    # Tiny slice + cast back to the module's f32 interface.
    return out_padded[:B, :out_size].astype(jnp.float32)


def init_params(key, input_size, output_size):
    """nn.Linear-style U(-1/sqrt(fan_in), 1/sqrt(fan_in)) init.

    Weights stored (in, out) in bf16; only the last layer's N dim is
    zero-padded to a multiple of 128 (lane-dense output). Biases stay f32.
    """
    N_pad = _round_up(output_size, LANE)
    dims = [(input_size, H1, input_size, H1),
            (H1, H2, H1, H2),
            (H2, H3, H2, H3),
            (H3, output_size, H3, N_pad)]
    params = []
    for fan_in, fan_out, r_pad, c_pad in dims:
        key, kw, kb = jax.random.split(key, 3)
        bound = 1.0 / jnp.sqrt(fan_in)
        w = jax.random.uniform(kw, (fan_in, fan_out), jnp.float32, -bound, bound)
        b = jax.random.uniform(kb, (1, fan_out), jnp.float32, -bound, bound)
        w_p = jnp.zeros((r_pad, c_pad), jnp.float32).at[:fan_in, :fan_out].set(w)
        b_p = jnp.zeros((1, c_pad), jnp.float32).at[:, :fan_out].set(b)
        params += [w_p.astype(jnp.bfloat16), b_p]
    return params


def reference_forward(x, params, out_size):
    """Pure-JAX reference using the same (bf16-stored) params, f32 math."""
    if x.ndim == 3:
        x = x.reshape(x.shape[0], -1)
    w1, b1, w2, b2, w3, b3, w4, b4 = [p.astype(jnp.float32) for p in params]
    xf = x.astype(jnp.bfloat16).astype(jnp.float32)  # match in-kernel x cast
    h = jnp.maximum(xf @ w1 + b1, 0.0)
    h = jnp.maximum(h @ w2 + b2, 0.0)
    h = jnp.maximum(h @ w3 + b3, 0.0)
    return jnp.tanh(h @ w4 + b4)[:, :out_size]


if __name__ == "__main__":
    key = jax.random.PRNGKey(0)
    key, kx = jax.random.split(key)

    batch, seq, feat = 8, 4, 8          # 3D input -> flattened to (8, 32)
    input_size = seq * feat             # 32
    output_size = 16

    x = jax.random.normal(kx, (batch, seq, feat), jnp.float32)
    params = init_params(key, input_size, output_size)

    out = nn_expert_forward(x, params, output_size)
    jax.block_until_ready(out)

    ref = reference_forward(x, params, output_size)
    assert out.shape == (batch, output_size)
    assert out.dtype == jnp.float32
    # bf16 matmul operands / bf16 output (f32 accumulation) -> loosened tolerance.
    assert jnp.allclose(out, ref, atol=3e-2, rtol=3e-2), \
        float(jnp.max(jnp.abs(out - ref)))

    print("KERNEL_OK")
</pallas_src>

<mosaic_0001>
module attributes {stable_mosaic.version = 11 : i64} {
  func.func @nn_expert_kernel(%arg0: i32, %arg1: memref<8x32xf32, #tpu.memory_space<vmem>>, %arg2: memref<32x128xbf16, #tpu.memory_space<vmem>>, %arg3: memref<1x128xf32, #tpu.memory_space<vmem>>, %arg4: memref<128x256xbf16, #tpu.memory_space<vmem>>, %arg5: memref<1x256xf32, #tpu.memory_space<vmem>>, %arg6: memref<256x128xbf16, #tpu.memory_space<vmem>>, %arg7: memref<1x128xf32, #tpu.memory_space<vmem>>, %arg8: memref<128x128xbf16, #tpu.memory_space<vmem>>, %arg9: memref<1x128xf32, #tpu.memory_space<vmem>>, %arg10: memref<8x128xbf16, #tpu.memory_space<vmem>>) attributes {dimension_semantics = [#tpu.dimension_semantics<parallel>], iteration_bounds = array<i64: 1>, scalar_prefetch = 0 : i64, scratch_operands = 0 : i64, tpu.core_type = #tpu.core_type<tc>, window_params = [{transform_indices = @transform_0, window_bounds = array<i64: 8, 32>}, {pipeline_mode = #tpu.pipeline_mode<synchronous>, transform_indices = @transform_1, window_bounds = array<i64: 32, 128>}, {pipeline_mode = #tpu.pipeline_mode<synchronous>, transform_indices = @transform_2, window_bounds = array<i64: 1, 128>}, {pipeline_mode = #tpu.pipeline_mode<synchronous>, transform_indices = @transform_3, window_bounds = array<i64: 128, 256>}, {pipeline_mode = #tpu.pipeline_mode<synchronous>, transform_indices = @transform_4, window_bounds = array<i64: 1, 256>}, {pipeline_mode = #tpu.pipeline_mode<synchronous>, transform_indices = @transform_5, window_bounds = array<i64: 256, 128>}, {pipeline_mode = #tpu.pipeline_mode<synchronous>, transform_indices = @transform_6, window_bounds = array<i64: 1, 128>}, {pipeline_mode = #tpu.pipeline_mode<synchronous>, transform_indices = @transform_7, window_bounds = array<i64: 128, 128>}, {pipeline_mode = #tpu.pipeline_mode<synchronous>, transform_indices = @transform_8, window_bounds = array<i64: 1, 128>}, {transform_indices = @transform_9, window_bounds = array<i64: 8, 128>}]} {
    %c0 = arith.constant 0 : index
    %c0_0 = arith.constant 0 : index
    %0 = vector.load %arg1[%c0, %c0_0] : memref<8x32xf32, #tpu.memory_space<vmem>>, vector<8x32xf32>
    %1 = arith.truncf %0 : vector<8x32xf32> to vector<8x32xbf16>
    %c0_1 = arith.constant 0 : index
    %c0_2 = arith.constant 0 : index
    %2 = vector.load %arg2[%c0_1, %c0_2] : memref<32x128xbf16, #tpu.memory_space<vmem>>, vector<32x128xbf16>
    %cst = arith.constant dense<0.000000e+00> : vector<8x128xf32>
    %3 = tpu.matmul %1, %2, %cst {dimension_numbers = #tpu.dot_dimension_numbers<[1], [0], [0], [1], [0, 0, 1, 1], [], []>} : vector<8x32xbf16>, vector<32x128xbf16>, vector<8x128xf32> -> vector<8x128xf32>
    %c0_3 = arith.constant 0 : index
    %c0_4 = arith.constant 0 : index
    %4 = vector.load %arg3[%c0_3, %c0_4] : memref<1x128xf32, #tpu.memory_space<vmem>>, vector<1x128xf32>
    %5 = vector.broadcast %4 : vector<1x128xf32> to vector<8x128xf32>
    %6 = arith.addf %3, %5 : vector<8x128xf32>
    %cst_5 = arith.constant 0.000000e+00 : f32
    %7 = vector.broadcast %cst_5 : f32 to vector<8x128xf32>
    %8 = arith.maximumf %6, %7 : vector<8x128xf32>
    %9 = arith.truncf %8 : vector<8x128xf32> to vector<8x128xbf16>
    %c0_6 = arith.constant 0 : index
    %c0_7 = arith.constant 0 : index
    %10 = vector.load %arg4[%c0_6, %c0_7] : memref<128x256xbf16, #tpu.memory_space<vmem>>, vector<128x256xbf16>
    %cst_8 = arith.constant dense<0.000000e+00> : vector<8x256xf32>
    %11 = tpu.matmul %9, %10, %cst_8 {dimension_numbers = #tpu.dot_dimension_numbers<[1], [0], [0], [1], [0, 0, 1, 1], [], []>} : vector<8x128xbf16>, vector<128x256xbf16>, vector<8x256xf32> -> vector<8x256xf32>
    %c0_9 = arith.constant 0 : index
    %c0_10 = arith.constant 0 : index
    %12 = vector.load %arg5[%c0_9, %c0_10] : memref<1x256xf32, #tpu.memory_space<vmem>>, vector<1x256xf32>
    %13 = vector.broadcast %12 : vector<1x256xf32> to vector<8x256xf32>
    %14 = arith.addf %11, %13 : vector<8x256xf32>
    %cst_11 = arith.constant 0.000000e+00 : f32
    %15 = vector.broadcast %cst_11 : f32 to vector<8x256xf32>
    %16 = arith.maximumf %14, %15 : vector<8x256xf32>
    %17 = arith.truncf %16 : vector<8x256xf32> to vector<8x256xbf16>
    %c0_12 = arith.constant 0 : index
    %c0_13 = arith.constant 0 : index
    %18 = vector.load %arg6[%c0_12, %c0_13] : memref<256x128xbf16, #tpu.memory_space<vmem>>, vector<256x128xbf16>
    %cst_14 = arith.constant dense<0.000000e+00> : vector<8x128xf32>
    %19 = tpu.matmul %17, %18, %cst_14 {dimension_numbers = #tpu.dot_dimension_numbers<[1], [0], [0], [1], [0, 0, 1, 1], [], []>} : vector<8x256xbf16>, vector<256x128xbf16>, vector<8x128xf32> -> vector<8x128xf32>
    %c0_15 = arith.constant 0 : index
    %c0_16 = arith.constant 0 : index
    %20 = vector.load %arg7[%c0_15, %c0_16] : memref<1x128xf32, #tpu.memory_space<vmem>>, vector<1x128xf32>
    %21 = vector.broadcast %20 : vector<1x128xf32> to vector<8x128xf32>
    %22 = arith.addf %19, %21 : vector<8x128xf32>
    %cst_17 = arith.constant 0.000000e+00 : f32
    %23 = vector.broadcast %cst_17 : f32 to vector<8x128xf32>
    %24 = arith.maximumf %22, %23 : vector<8x128xf32>
    %25 = arith.truncf %24 : vector<8x128xf32> to vector<8x128xbf16>
    %c0_18 = arith.constant 0 : index
    %c0_19 = arith.constant 0 : index
    %26 = vector.load %arg8[%c0_18, %c0_19] : memref<128x128xbf16, #tpu.memory_space<vmem>>, vector<128x128xbf16>
    %cst_20 = arith.constant dense<0.000000e+00> : vector<8x128xf32>
    %27 = tpu.matmul %25, %26, %cst_20 {dimension_numbers = #tpu.dot_dimension_numbers<[1], [0], [0], [1], [0, 0, 1, 1], [], []>} : vector<8x128xbf16>, vector<128x128xbf16>, vector<8x128xf32> -> vector<8x128xf32>
    %c0_21 = arith.constant 0 : index
    %c0_22 = arith.constant 0 : index
    %28 = vector.load %arg9[%c0_21, %c0_22] : memref<1x128xf32, #tpu.memory_space<vmem>>, vector<1x128xf32>
    %29 = vector.broadcast %28 : vector<1x128xf32> to vector<8x128xf32>
    %30 = arith.addf %27, %29 : vector<8x128xf32>
    %31 = math.tanh %30 : vector<8x128xf32>
    %32 = arith.truncf %31 : vector<8x128xf32> to vector<8x128xbf16>
    %c0_23 = arith.constant 0 : index
    %c0_24 = arith.constant 0 : index
    %33 = vector.load %arg10[%c0_23, %c0_24] : memref<8x128xbf16, #tpu.memory_space<vmem>>, vector<8x128xbf16>
    tpu.vector_store %arg10[%c0_23, %c0_24], %32 {strides = array<i32>} : memref<8x128xbf16, #tpu.memory_space<vmem>>, vector<8x128xbf16>,
    return
  }
  func.func @transform_0(%arg0: i32) -> (i32, i32) {
    %c0_i32 = arith.constant 0 : i32
    %c0_i32_0 = arith.constant 0 : i32
    return %arg0, %c0_i32 : i32, i32
  }
  func.func @transform_1(%arg0: i32) -> (i32, i32) {
    %c0_i32 = arith.constant 0 : i32
    %c0_i32_0 = arith.constant 0 : i32
    %c0_i32_1 = arith.constant 0 : i32
    return %c0_i32, %c0_i32_0 : i32, i32
  }
  func.func @transform_2(%arg0: i32) -> (i32, i32) {
    %c0_i32 = arith.constant 0 : i32
    %c0_i32_0 = arith.constant 0 : i32
    %c0_i32_1 = arith.constant 0 : i32
    return %c0_i32, %c0_i32_0 : i32, i32
  }
  func.func @transform_3(%arg0: i32) -> (i32, i32) {
    %c0_i32 = arith.constant 0 : i32
    %c0_i32_0 = arith.constant 0 : i32
    %c0_i32_1 = arith.constant 0 : i32
    return %c0_i32, %c0_i32_0 : i32, i32
  }
  func.func @transform_4(%arg0: i32) -> (i32, i32) {
    %c0_i32 = arith.constant 0 : i32
    %c0_i32_0 = arith.constant 0 : i32
    %c0_i32_1 = arith.constant 0 : i32
    return %c0_i32, %c0_i32_0 : i32, i32
  }
  func.func @transform_5(%arg0: i32) -> (i32, i32) {
    %c0_i32 = arith.constant 0 : i32
    %c0_i32_0 = arith.constant 0 : i32
    %c0_i32_1 = arith.constant 0 : i32
    return %c0_i32, %c0_i32_0 : i32, i32
  }
  func.func @transform_6(%arg0: i32) -> (i32, i32) {
    %c0_i32 = arith.constant 0 : i32
    %c0_i32_0 = arith.constant 0 : i32
    %c0_i32_1 = arith.constant 0 : i32
    return %c0_i32, %c0_i32_0 : i32, i32
  }
  func.func @transform_7(%arg0: i32) -> (i32, i32) {
    %c0_i32 = arith.constant 0 : i32
    %c0_i32_0 = arith.constant 0 : i32
    %c0_i32_1 = arith.constant 0 : i32
    return %c0_i32, %c0_i32_0 : i32, i32
  }
  func.func @transform_8(%arg0: i32) -> (i32, i32) {
    %c0_i32 = arith.constant 0 : i32
    %c0_i32_0 = arith.constant 0 : i32
    %c0_i32_1 = arith.constant 0 : i32
    return %c0_i32, %c0_i32_0 : i32, i32
  }
  func.func @transform_9(%arg0: i32) -> (i32, i32) {
    %c0_i32 = arith.constant 0 : i32
    %c0_i32_0 = arith.constant 0 : i32
    return %arg0, %c0_i32 : i32, i32
  }
}

</mosaic_0001>

<bundles_post_ra>
// kernel: tpu_custom_call.1
= control target key start
LH: loop header
LB: loop body
LE: loop exit
PB: predicated region body
PF: predicated region fallthrough
CT: control target
= control target key end

     0   :  { %14 = vsyncpa [#allocation3], 0  ;;  %s1115_s0 = inlined_call_operand.hbm [shape: f32[8,32], index: 0, kind: input, shape index: {}]   ;;  %s1116_s1 = inlined_call_operand.hbm [shape: bf16[32,128], index: 1, kind: input, shape index: {}]   ;;  %s1117_s2 = inlined_call_operand.vmem [shape: f32[1,128], index: 2, kind: input, shape index: {}]   ;;  %s1118_s3 = inlined_call_operand.hbm [shape: bf16[128,256], index: 3, kind: input, shape index: {}]   ;;  %s1119_s4 = inlined_call_operand.vmem [shape: f32[1,256], index: 4, kind: input, shape index: {}]   ;;  %s1120_s5 = inlined_call_operand.hbm [shape: bf16[256,128], index: 5, kind: input, shape index: {}]   ;;  %s1121_s6 = inlined_call_operand.vmem [shape: f32[1,128], index: 6, kind: input, shape index: {}]   ;;  %s1122_s7 = inlined_call_operand.hbm [shape: bf16[128,128], index: 7, kind: input, shape index: {}]   ;;  %s1123_s8 = inlined_call_operand.vmem [shape: f32[1,128], index: 8, kind: input, shape index: {}]   ;;  %s1124_s9 = inlined_call_operand.hbm [shape: bf16[8,128], index: 9, kind: output, shape index: {}]  }
   0x1   :  { %15 = vsyncpa [#allocation6], 0 }
   0x2   :  { %16 = vsyncpa [#allocation9], 0 }
   0x3   :  { %17 = vsyncpa [#allocation4], 0  ;;  %s945_s30 = smov [#allocation5]   ;;  %s805_s13 = scalar_lea.hbm %s1116_s1, 256 }
   0x4   :  { %s33_s10 = sshll.u32 %s945_s30, 4  ;;  %p806_p0 = scmp.ne.s32.totalorder %s1116_s1, %s805_s13  ;;  %s34_s10 = int_to_ptr.vmem [resolvable:$true] %s33_s10 }
   0x5   :  { %p809_p1 = scmp.lt.u32.totalorder %s805_s13, %s1116_s1 }
   0x7   :  { %p811_p2 = pnand %p809_p1, %p806_p0 }
   0x9   :  { %814 = shalt.err (!%p811_p2)
}
   0xa   :  { %s815_s18 = scalar_lea.vmem %s34_s10, 256  ;;  %p820_p4 = scmp.lt.s32.totalorder %s34_s10, %s34_s10 }
   0xb   :  { %p816_p3 = scmp.ne.s32.totalorder %s34_s10, %s815_s18  ;;  %p821_p5 = scmp.lt.s32.totalorder %s815_s18, %s815_s18 }
   0xd   :  { %p822_p6 = por %p821_p5, %p820_p4 }
   0xf   :  { %p823_p7 = pnand %p822_p6, %p816_p3 }
  0x11   :  { %826 = shalt.err (!%p823_p7)
}
  0x12   :  { %s946_s19 = smov 64   ;;  %s947_s20 = smov 4  }
  0x13   :  { %39 = dma.hbm_to_vmem [thread:$0]  %s1116_s1, 256, %s34_s10, [#allocation6], %s946_s19, %s946_s19, %s947_s20  }
  0x14   :  { %s948_s23 = smov [#allocation8]   ;;  %s949_s25 = smov [#allocation2]  }
  0x15   :  { %s61_s24 = sshll.u32 %s948_s23, 4  ;;  %s24_s26 = sshll.u32 %s949_s25, 4  ;;  %s62_s24 = int_to_ptr.vmem [resolvable:$true] %s61_s24  ;;  %s25_s26 = int_to_ptr.vmem [resolvable:$true] %s24_s26 }
  0x16   :  { %s827_s29 = scalar_lea.hbm %s1120_s5, 2048 }
  0x17   :  { %p828_p8 = scmp.ne.s32.totalorder %s1120_s5, %s827_s29  ;;  %p831_p9 = scmp.lt.u32.totalorder %s827_s29, %s1120_s5 }
  0x19   :  { %p833_p10 = pnand %p831_p9, %p828_p8 }
  0x1b   :  { %836 = shalt.err (!%p833_p10)
}
  0x1c   :  { %s837_s1 = scalar_lea.vmem %s62_s24, 2048  ;;  %p842_p12 = scmp.lt.s32.totalorder %s62_s24, %s62_s24 }
  0x1d   :  { %p838_p11 = scmp.ne.s32.totalorder %s62_s24, %s837_s1  ;;  %p843_p13 = scmp.lt.s32.totalorder %s837_s1, %s837_s1 }
  0x1f   :  { %p844_p0 = por %p843_p13, %p842_p12 }
  0x21   :  { %p845_p1 = pnand %p844_p0, %p838_p11 }
  0x23   :  { %848 = shalt.err (!%p845_p1)
}
  0x24   :  { %67 = dma.hbm_to_vmem [thread:$0]  %s1120_s5, 2048, %s62_s24, [#allocation9], %s946_s19, %s946_s19, %s947_s20  }
  0x25   :  { %s849_s17 = scalar_lea.hbm %s1115_s0, 128 }
  0x26   :  { %p850_p2 = scmp.ne.s32.totalorder %s1115_s0, %s849_s17  ;;  %p853_p3 = scmp.lt.u32.totalorder %s849_s17, %s1115_s0 }
  0x28   :  { %p855_p4 = pnand %p853_p3, %p850_p2 }
  0x2a   :  { %858 = shalt.err (!%p855_p4)
}
  0x2b   :  { %s859_s25 = scalar_lea.vmem %s25_s26, 128  ;;  %p864_p6 = scmp.lt.s32.totalorder %s25_s26, %s25_s26 }
  0x2c   :  { %p860_p5 = scmp.ne.s32.totalorder %s25_s26, %s859_s25  ;;  %p865_p7 = scmp.lt.s32.totalorder %s859_s25, %s859_s25 }
  0x2e   :  { %p866_p8 = por %p865_p7, %p864_p6 }
  0x30   :  { %p867_p9 = pnand %p866_p8, %p860_p5 }
  0x32   :  { %870 = shalt.err (!%p867_p9)
}
  0x33   :  { %27 = dma.hbm_to_vmem [thread:$0]  %s1115_s0, 128, %s25_s26, [#allocation3]  }
  0x34   :  { %s950_s27 = smov [#allocation7]   ;;  %s871_s11 = scalar_lea.hbm %s1118_s3, 2048 }
  0x35   :  { %s47_s28 = sshll.u32 %s950_s27, 4  ;;  %p872_p10 = scmp.ne.s32.totalorder %s1118_s3, %s871_s11  ;;  %s48_s28 = int_to_ptr.vmem [resolvable:$true] %s47_s28 }
  0x36   :  { %p875_p11 = scmp.lt.u32.totalorder %s871_s11, %s1118_s3 }
  0x38   :  { %p877_p12 = pnand %p875_p11, %p872_p10 }
  0x3a   :  { %880 = shalt.err (!%p877_p12)
}
  0x3b   :  { %s881_s14 = scalar_lea.vmem %s48_s28, 2048  ;;  %p886_p0 = scmp.lt.s32.totalorder %s48_s28, %s48_s28 }
  0x3c   :  { %p882_p13 = scmp.ne.s32.totalorder %s48_s28, %s881_s14  ;;  %p887_p1 = scmp.lt.s32.totalorder %s881_s14, %s881_s14 }
  0x3e   :  { %p888_p2 = por %p887_p1, %p886_p0 }
  0x40   :  { %p889_p3 = pnand %p888_p2, %p882_p13 }
  0x42   :  { %892 = shalt.err (!%p889_p3)
}
  0x43   :  { %s951_s0 = smov 128   ;;  %s952_s26 = smov 8  }
  0x44   :  { %53 = dma.hbm_to_vmem [thread:$0]  %s1118_s3, 2048, %s48_s28, [#allocation6], %s951_s0, %s951_s0, %s952_s26  }
  0x45   :  { %s953_s17 = smov [#allocation10]   ;;  %s893_s23 = scalar_lea.hbm %s1122_s7, 1024 }
  0x46   :  { %s75_s18 = sshll.u32 %s953_s17, 4  ;;  %p894_p4 = scmp.ne.s32.totalorder %s1122_s7, %s893_s23  ;;  %s76_s18 = int_to_ptr.vmem [resolvable:$true] %s75_s18 }
  0x47   :  { %p897_p5 = scmp.lt.u32.totalorder %s893_s23, %s1122_s7 }
  0x49   :  { %p899_p6 = pnand %p897_p5, %p894_p4 }
  0x4b   :  { %902 = shalt.err (!%p899_p6)
}
  0x4c   :  { %s903_s29 = scalar_lea.vmem %s76_s18, 1024  ;;  %p908_p8 = scmp.lt.s32.totalorder %s76_s18, %s76_s18 }
  0x4d   :  { %p904_p7 = scmp.ne.s32.totalorder %s76_s18, %s903_s29  ;;  %p909_p9 = scmp.lt.s32.totalorder %s903_s29, %s903_s29 }
  0x4f   :  { %p910_p10 = por %p909_p9, %p908_p8 }
  0x51   :  { %p911_p11 = pnand %p910_p10, %p904_p7 }
  0x53   :  { %914 = shalt.err (!%p911_p11)
}
  0x54   :  { %81 = dma.hbm_to_vmem [thread:$0]  %s1122_s7, 1024, %s76_s18, [#allocation9], %s946_s19, %s946_s19, %s947_s20  }
  0x55   :  { %937 = dma.done.wait [#allocation3], 128  }
  0x56   :  { %938 = vsyncadd [#allocation3], 4294967168 }
  0x57   :  { %939 = dma.done.wait [#allocation6], 2304  }
  0x58   :  { %940 = vsyncadd [#allocation6], 4294964992 }
  0x59   :  { %941 = dma.done.wait [#allocation9], 3072  }
  0x5a   :  { %942 = vsyncadd [#allocation9], 4294964224  ;;  %v954_v0 = vmov 0.0   ;;  %vm955_vm0 = vmmov 0   ;;  %v753_v1 = vld [vmem:[#allocation5] sm:$0xff]   ;;  %v754_v2 = vld [vmem:[#allocation5 + $0x8] sm:$0xff]   ;;  %v189_v52 = vlaneseq }
  0x5b   :  { %712 = vmatprep.subr.bf16.mxu0 %v954_v0  ;;  %716 = vmatprep.mubr.msk.bf16.mxu0 %vm955_vm0, %v954_v0  ;;  %v100_v3 = vld [vmem:[#allocation2] sm:$0xff]  ;;  %v758_v6 = vld [vmem:[#allocation7 + $0x14] ss:$8 sps:$4 sm:$0xff]   ;;  %vm125_vm1 = vcmask 261120   ;;  %v760_v8 = vld [vmem:[#allocation7 + $0x10] ss:$8 sps:$4 sm:$0xff]  }
  0x5c   :  { %713 = vmatpush3.bf16.msra.mxu0 %v753_v1  ;;  %v755_v4 = vld [vmem:[#allocation7 + $0x4] ss:$8 sps:$4 sm:$0xff]   ;;  %v757_v5 = vld [vmem:[#allocation7] ss:$8 sps:$4 sm:$0xff]   ;;  %v101_v7 = vpack.c.bf16 %v100_v3, %v100_v3  ;;  %v764_v11 = vld [vmem:[#allocation7 + $0x34] ss:$8 sps:$4 sm:$0xff]  }
  0x5d   :  { %714 = vmatprep.subr.bf16.mxu0 %v954_v0  ;;  %279 = vmatprep.subr.bf16.mxu1 %v755_v4  ;;  %v761_v9 = vld [vmem:[#allocation7 + $0x24] ss:$8 sps:$4 sm:$0xff]   ;;  %v763_v10 = vld [vmem:[#allocation7 + $0x20] ss:$8 sps:$4 sm:$0xff]   ;;  %v766_v12 = vld [vmem:[#allocation7 + $0x30] ss:$8 sps:$4 sm:$0xff]  }
  0x5e   :  { %280 = vmatpush1.bf16.msra.mxu1 %v757_v5  ;;  %v767_v13 = vld [vmem:[#allocation7 + $0x44] ss:$8 sps:$4 sm:$0xff]   ;;  %v769_v14 = vld [vmem:[#allocation7 + $0x40] ss:$8 sps:$4 sm:$0xff]   ;;  %v770_v15 = vld [vmem:[#allocation7 + $0x54] ss:$8 sps:$4 sm:$0xff]  }
  0x5f   :  { %281 = vmatprep.subr.bf16.mxu1 %v758_v6  ;;  %v772_v16 = vld [vmem:[#allocation7 + $0x50] ss:$8 sps:$4 sm:$0xff]   ;;  %v773_v17 = vld [vmem:[#allocation7 + $0x64] ss:$8 sps:$4 sm:$0xff]   ;;  %v775_v18 = vld [vmem:[#allocation7 + $0x60] ss:$8 sps:$4 sm:$0xff]  }
  0x60   :  { %715 = vmatpush3.bf16.msra.mxu0 %v754_v2  ;;  %v776_v19 = vld [vmem:[#allocation7 + $0x74] ss:$8 sps:$4 sm:$0xff]   ;;  %v778_v20 = vld [vmem:[#allocation7 + $0x70] ss:$8 sps:$4 sm:$0xff]   ;;  %v956_v21 = vmov 0   ;;  %v779_v22 = vld [vmem:[#allocation8 + $0x40] sm:$0xff]  }
  0x61   :  { %311 = vmatprep.mubr.bf16.mxu1 %v956_v21  ;;  %v780_v23 = vld [vmem:[#allocation8] sm:$0xff]   ;;  %v781_v24 = vld [vmem:[#allocation8 + $0x48] sm:$0xff]   ;;  %681 = vmatprep.subr.bf16.mxu0 %v779_v22  ;;  %v783_v26 = vld [vmem:[#allocation8 + $0x50] sm:$0xff]   ;;  %v190_v53 = vshrl.u32 %v189_v52, 7  ;;  %s957_s13 = smov [#allocation11]  }
  0x62   :  { %282 = vmatpush1.bf16.msra.mxu1 %v760_v8  ;;  %v782_v25 = vld [vmem:[#allocation8 + $0x8] sm:$0xff]   ;;  %v784_v27 = vld [vmem:[#allocation8 + $0x10] sm:$0xff]   ;;  %v785_v28 = vld [vmem:[#allocation8 + $0x58] sm:$0xff]  }
  0x63   :  { %717 = vmatmul.mubr.msk.bf16.vlgmr.msra.gmra.mrb[0].mxu0 %vm125_vm1, %v101_v7  ;;  %283 = vmatprep.subr.bf16.mxu1 %v761_v9  ;;  %v786_v29 = vld [vmem:[#allocation8 + $0x18] sm:$0xff]   ;;  %v787_v30 = vld [vmem:[#allocation8 + $0x60] sm:$0xff]   ;;  %v789_v32 = vld [vmem:[#allocation8 + $0x68] sm:$0xff]   ;;  %v191_v54 = vsub.s32 0, %v190_v53  ;;  %v195_v56 = vsub.s32 1, %v190_v53 }
  0x64   :  { %682 = vmatpush3.bf16.msra.mxu0 %v780_v23  ;;  %v788_v31 = vld [vmem:[#allocation8 + $0x20] sm:$0xff]   ;;  %v790_v33 = vld [vmem:[#allocation8 + $0x28] sm:$0xff]   ;;  %v791_v42 = vld [vmem:[#allocation8 + $0x70] sm:$0xff]  }
  0x65   :  { %683 = vmatprep.subr.bf16.mxu0 %v781_v24  ;;  %v632_v34 = vld [vmem:[%s1117_s2] ss:$0 sm:$0xff]  ;;  %v792_v43 = vld [vmem:[#allocation8 + $0x30] sm:$0xff]   ;;  %v793_v44 = vld [vmem:[#allocation8 + $0x78] sm:$0xff]  }
  0x66   :  { %284 = vmatpush1.bf16.msra.mxu1 %v763_v10  ;;  %v794_v45 = vld [vmem:[#allocation8 + $0x38] sm:$0xff]   ;;  %v795_v46 = vld [vmem:[#allocation10] sm:$0xff]   ;;  %v796_v47 = vld [vmem:[#allocation10 + $0x8] sm:$0xff]  }
  0x67   :  { %285 = vmatprep.subr.bf16.mxu1 %v764_v11  ;;  %v797_v48 = vld [vmem:[#allocation10 + $0x10] sm:$0xff]   ;;  %v798_v49 = vld [vmem:[#allocation10 + $0x18] sm:$0xff]   ;;  %v799_v50 = vld [vmem:[#allocation10 + $0x20] sm:$0xff]  }
  0x68   :  { %684 = vmatpush3.bf16.msra.mxu0 %v782_v25  ;;  %v800_v51 = vld [vmem:[#allocation10 + $0x28] sm:$0xff]   ;;  %v801_v6 = vld [vmem:[#allocation10 + $0x30] sm:$0xff]   ;;  %v802_v7 = vld [vmem:[#allocation10 + $0x38] sm:$0xff]  }
  0x69   :  { %685 = vmatprep.subr.bf16.mxu0 %v783_v26  ;;  %v187_v55 = vld [vmem:[%s1119_s4] sm:$0x3] }
  0x6a   :  { %286 = vmatpush1.bf16.msra.mxu1 %v766_v12  ;;  %v192_v57 = vrot.slane %v187_v55, %v191_v54  ;;  %v196_v58 = vrot.slane %v187_v55, %v195_v56  ;;  %v652_v9 = vld [vmem:[%s1121_s6] ss:$0 sm:$0xff]  ;;  %s621_s6 = sshll.u32 %s957_s13, 4  ;;  %s622_s6 = int_to_ptr.vmem [resolvable:$true] %s621_s6 }
  0x6b   :  { %287 = vmatprep.subr.bf16.mxu1 %v767_v13  ;;  %s915_s1 = scalar_lea.vmem %s622_s6, 64  ;;  %p920_p13 = scmp.lt.s32.totalorder %s622_s6, %s622_s6 }
  0x6c   :  { %686 = vmatpush3.bf16.msra.mxu0 %v784_v27  ;;  %p916_p12 = scmp.ne.s32.totalorder %s622_s6, %s915_s1  ;;  %p921_p0 = scmp.lt.s32.totalorder %s915_s1, %s915_s1 }
  0x6d   :  { %687 = vmatprep.subr.bf16.mxu0 %v785_v28 }
  0x6e   :  { %288 = vmatpush1.bf16.msra.mxu1 %v769_v14  ;;  %p922_p1 = por %p921_p0, %p920_p13 }
  0x6f   :  { %289 = vmatprep.subr.bf16.mxu1 %v770_v15 }
  0x70   :  { %688 = vmatpush3.bf16.msra.mxu0 %v786_v29  ;;  %p923_p2 = pnand %p922_p1, %p916_p12 }
  0x71   :  { %689 = vmatprep.subr.bf16.mxu0 %v787_v30 }
  0x72   :  { %290 = vmatpush1.bf16.msra.mxu1 %v772_v16 }
  0x73   :  { %291 = vmatprep.subr.bf16.mxu1 %v773_v17  ;;  %v669_v17 = vld [vmem:[%s1123_s8] ss:$0 sm:$0xff] }
  0x74   :  { %690 = vmatpush3.bf16.msra.mxu0 %v788_v31 }
  0x75   :  { %691 = vmatprep.subr.bf16.mxu0 %v789_v32 }
  0x76   :  { %292 = vmatpush1.bf16.msra.mxu1 %v775_v18 }
  0x77   :  { %293 = vmatprep.subr.bf16.mxu1 %v776_v19 }
  0x78   :  { %692 = vmatpush3.bf16.msra.mxu0 %v790_v33 }
  0x79   :  { %693 = vmatprep.subr.bf16.mxu0 %v791_v42 }
  0x7a   :  { %294 = vmatpush1.bf16.msra.mxu1 %v778_v20 }
  0x7b   :  { %720 = vmatprep.subr.bf16.mxu1 %v954_v0 }
  0x7c   :  { %694 = vmatpush3.bf16.msra.mxu0 %v792_v43 }
  0x7d   :  { %695 = vmatprep.subr.bf16.mxu0 %v793_v44 }
  0x80   :  { %696 = vmatpush3.bf16.msra.mxu0 %v794_v45 }
 0x136   :  { %v163_v35 = vpop.f32.mrb[0].mxu0 }
 0x137   :  { %v164_v36 = vadd.f32 %v632_v34, %v163_v35  ;;  %v718_v37 = vpop.f32.mrb[1].mxu0 }
 0x138   :  { %v166_v38 = vpop.f32.mrb[2].mxu0 }
 0x139   :  { %v169_v39 = vmax.f32 %v164_v36, 0.0  ;;  %v719_v40 = vpop.f32.mrb[3].mxu0 }
 0x13b   :  { %v170_v41 = vpack.c.bf16 %v169_v39, %v169_v39 }
 0x13d   :  { %312 = vmatmul.mubr.bf16.vlgmr.msra.gmra.mrb[0].mxu1 %v170_v41 }
 0x13e   :  { %736 = vmatprep.mubr.msk.bf16.mxu1 %vm955_vm0, %v954_v0  ;;  %721 = vmatpush3.bf16.msra.mxu1 %v795_v46 }
 0x13f   :  { %722 = vmatprep.subr.bf16.mxu1 %v954_v0 }
 0x142   :  { %723 = vmatpush3.bf16.msra.mxu1 %v796_v47 }
 0x143   :  { %724 = vmatprep.subr.bf16.mxu1 %v954_v0 }
 0x146   :  { %725 = vmatpush3.bf16.msra.mxu1 %v797_v48 }
 0x147   :  { %726 = vmatprep.subr.bf16.mxu1 %v954_v0 }
 0x14a   :  { %727 = vmatpush3.bf16.msra.mxu1 %v798_v49 }
 0x14b   :  { %728 = vmatprep.subr.bf16.mxu1 %v954_v0 }
 0x14e   :  { %729 = vmatpush3.bf16.msra.mxu1 %v799_v50 }
 0x14f   :  { %730 = vmatprep.subr.bf16.mxu1 %v954_v0 }
 0x152   :  { %731 = vmatpush3.bf16.msra.mxu1 %v800_v51 }
 0x153   :  { %732 = vmatprep.subr.bf16.mxu1 %v954_v0 }
 0x156   :  { %733 = vmatpush3.bf16.msra.mxu1 %v801_v6 }
 0x157   :  { %734 = vmatprep.subr.bf16.mxu1 %v954_v0 }
 0x15a   :  { %735 = vmatpush3.bf16.msra.mxu1 %v802_v7 }
 0x210   :  { %v313_v59 = vpop.f32.mrb[0].mxu1 }
 0x211   :  { %v314_v60 = vadd.f32 %v313_v59, %v192_v57  ;;  %v315_v61 = vpop.f32.mrb[1].mxu1 }
 0x212   :  { %v316_v62 = vadd.f32 %v315_v61, %v196_v58  ;;  %v317_v63 = vpop.f32.mrb[2].mxu1 }
 0x213   :  { %v320_v1 = vmax.f32 %v314_v60, 0.0  ;;  %v318_v2 = vpop.f32.mrb[3].mxu1 }
 0x214   :  { %v321_v3 = vmax.f32 %v316_v62, 0.0 }
 0x215   :  { %v322_v5 = vpack.c.bf16 %v320_v1, %v320_v1 }
 0x216   :  { %v323_v4 = vpack.c.bf16 %v321_v3, %v321_v3 }
 0x218   :  { %491 = vmatprep.mubr.bf16.mxu0 %v323_v4 }
 0x219   :  { %492 = vmatmul.mubr.bf16.vlgmr.msra.gmra.mrb[4].mxu0 %v322_v5 }
 0x2ec   :  { %v697_v8 = vpop.f32.mrb[4].mxu0 }
 0x2ed   :  { %v698_v10 = vpop.f32.mrb[5].mxu0 }
 0x2ee   :  { %v699_v11 = vadd.f32 %v698_v10, %v697_v8  ;;  %v700_v12 = vpop.f32.mrb[6].mxu0 }
 0x2ef   :  { %v701_v13 = vpop.f32.mrb[7].mxu0 }
 0x2f0   :  { %v494_v14 = vadd.f32 %v699_v11, %v652_v9 }
 0x2f2   :  { %v499_v15 = vmax.f32 %v494_v14, 0.0 }
 0x2f4   :  { %v500_v16 = vpack.c.bf16 %v499_v15, %v499_v15 }
 0x2f6   :  { %737 = vmatmul.mubr.bf16.vlgmr.msra.gmra.mrb[4].mxu1 %v500_v16 }
 0x3c9   :  { %v606_v0 = vpop.f32.mrb[4].mxu1 }
 0x3ca   :  { %v607_v18 = vadd.f32 %v669_v17, %v606_v0  ;;  %v738_v19 = vpop.f32.mrb[5].mxu1 }
 0x3cb   :  { %v609_v20 = vpop.f32.mrb[6].mxu1 }
 0x3cc   :  { %803 = vtanh.f32 %v607_v18  ;;  %v739_v21 = vpop.f32.mrb[7].mxu1 }
 0x3d6   :  { %v804_v22 = vpop.eup %803 }
 0x3d7   :  { %v613_v23 = vpack.c.bf16 %v804_v22, %v804_v22 }
 0x3d9   :  { %614 = vst [vmem:[#allocation11] sm:$0xf] %v613_v23 }
 0x3da   :  { %926 = shalt.err (!%p923_p2)
}
 0x3db   :  { %s927_s14 = scalar_lea.hbm %s1124_s9, 64 }
 0x3dc   :  { %p928_p3 = scmp.ne.s32.totalorder %s1124_s9, %s927_s14  ;;  %p931_p4 = scmp.lt.u32.totalorder %s927_s14, %s1124_s9 }
 0x3de   :  { %p933_p5 = pnand %p931_p4, %p928_p3 }
 0x3e0   :  { %936 = shalt.err (!%p933_p5)
}
 0x3e1   :  { %624 = dma.vmem_to_hbm [thread:$0]  %s622_s6, 64, %s1124_s9, [#allocation4]  }
 0x3e2   :  { %943 = dma.done.wait [#allocation4], 64  }
 0x3e3   :  { %944 = vsyncadd [#allocation4], 4294967232 }
 0x3e4   :  { %628 = vsyncpa [#allocation3], 1 }
 0x3e5   :  { %629 = vsyncpa [#allocation6], 1 }
 0x3e6   :  { %630 = vsyncpa [#allocation9], 1 }
 0x3e7   :  { %631 = vsyncpa [#allocation4], 1 }

</bundles_post_ra>
